<compile_context>
chip_gen: v5e
topology: v5e:2x2
jax: 0.10.0
libtpu: 0.0.40
codegen_flags: <defaults>
</compile_context>

<pallas_src>
import jax
import jax.numpy as jnp
from jax.experimental import pallas as pl
from jax.experimental.pallas import tpu as pltpu

_BN_EPS = 1e-5
_VMEM_LIMIT = 48 * 1024 * 1024  # safe on v7x (64 MiB physical), ample on v5e/v6e


def _leaky_relu(x, slope=0.2):
    return jnp.where(x >= 0, x, slope * x)


def _stats_kernel(x_ref, w1_ref, b1_ref, w2_ref, sum_ref, sumsq_ref):
    # x: (Cin, TILE_M) f32   w1: (ndf, Cin) bf16   b1: (ndf, 1) f32   w2: (2ndf, ndf) bf16
    # sum/sumsq: (2ndf, 1) f32 accumulators, resident per core across grid axis 1.
    @pl.when(pl.program_id(1) == 0)
    def _init():
        sum_ref[...] = jnp.zeros_like(sum_ref)
        sumsq_ref[...] = jnp.zeros_like(sumsq_ref)

    xb = x_ref[...].astype(jnp.bfloat16)
    h1 = _leaky_relu(
        jnp.dot(w1_ref[...], xb, preferred_element_type=jnp.float32) + b1_ref[...])
    h2 = jnp.dot(w2_ref[...], h1.astype(jnp.bfloat16),
                 preferred_element_type=jnp.float32)

    sum_ref[...] += jnp.sum(h2, axis=1, keepdims=True)
    sumsq_ref[...] += jnp.sum(h2 * h2, axis=1, keepdims=True)


def _forward_kernel(x_ref, w1_ref, b1_ref, w2s_ref, b2_ref, w3_ref, o_ref):
    # Recompute h1 (cheap), apply BN-folded second conv, LeakyReLU, final 1x1 conv.
    xb = x_ref[...].astype(jnp.bfloat16)
    h1 = _leaky_relu(
        jnp.dot(w1_ref[...], xb, preferred_element_type=jnp.float32) + b1_ref[...])
    h2n = _leaky_relu(
        jnp.dot(w2s_ref[...], h1.astype(jnp.bfloat16),
                preferred_element_type=jnp.float32) + b2_ref[...])
    # lane-dense (1, TILE_M) output block
    o_ref[...] = jnp.dot(w3_ref[...], h2n.astype(jnp.bfloat16),
                         preferred_element_type=jnp.float32)


def pixel_discriminator(x_nchw, params, tile_m=8192):
    """x_nchw: (N, Cin, H, W) float32. Returns (N, 1, H, W) float32."""
    w1, b1, w2, w3 = params          # f32: (ndf,Cin) (ndf,1) (2ndf,ndf) (1,2ndf)
    n, c, h, w = x_nchw.shape
    m = n * h * w
    c2 = w2.shape[0]                 # 2*ndf

    # pixels-on-lanes layout: (Cin, M)
    x_t = jnp.transpose(x_nchw, (1, 0, 2, 3)).reshape(c, m)

    tile_m = max(128, (tile_m // 128) * 128)
    tile_m = min(tile_m, pl.cdiv(m, 128) * 128)

    # Pass 1 splits its tile axis across 2 TensorCores (megacore on v7x); on 1-TC
    # chips the "parallel" axis is just a 2-iteration outer loop.
    num_cores = 2
    tiles_total = pl.cdiv(m, tile_m)
    tiles_per_core = pl.cdiv(tiles_total, num_cores)
    num_tiles = num_cores * tiles_per_core
    m_pad = num_tiles * tile_m
    if m_pad != m:
        x_t = jnp.pad(x_t, ((0, 0), (0, m_pad - m)))

    # bf16 copies of the matmul weights (biases / BN math stay f32).
    w1b = w1.astype(jnp.bfloat16)
    w2b = w2.astype(jnp.bfloat16)
    w3b = w3.astype(jnp.bfloat16)

    # ---- pass 1: global BatchNorm statistics of h2 (per-core partial sums) ------
    sum_parts, sumsq_parts = pl.pallas_call(
        _stats_kernel,
        grid=(num_cores, tiles_per_core),
        in_specs=[
            pl.BlockSpec((c, tile_m),
                         lambda core, i: (0, core * tiles_per_core + i)),
            pl.BlockSpec(w1b.shape, lambda core, i: (0, 0)),
            pl.BlockSpec(b1.shape, lambda core, i: (0, 0)),
            pl.BlockSpec(w2b.shape, lambda core, i: (0, 0)),
        ],
        out_specs=(pl.BlockSpec((None, c2, 1), lambda core, i: (core, 0, 0)),
                   pl.BlockSpec((None, c2, 1), lambda core, i: (core, 0, 0))),
        out_shape=(jax.ShapeDtypeStruct((num_cores, c2, 1), jnp.float32),
                   jax.ShapeDtypeStruct((num_cores, c2, 1), jnp.float32)),
        compiler_params=pltpu.CompilerParams(
            dimension_semantics=("parallel", "arbitrary"),
            vmem_limit_bytes=_VMEM_LIMIT),
    )(x_t, w1b, b1, w2b)

    h2_sum = jnp.sum(sum_parts, axis=0)        # (c2, 1)
    h2_sumsq = jnp.sum(sumsq_parts, axis=0)    # (c2, 1)

    # Analytic padding correction: padded x columns are exactly zero, so every padded
    # column contributes the identical vector h2_pad = w2 @ leaky(b1).
    pad_cols = m_pad - m
    if pad_cols:
        h1_pad = _leaky_relu(b1)                                   # (ndf, 1) f32
        h2_pad = jnp.dot(w2b, h1_pad.astype(jnp.bfloat16),
                         preferred_element_type=jnp.float32)       # (c2, 1) f32
        h2_sum = h2_sum - pad_cols * h2_pad
        h2_sumsq = h2_sumsq - pad_cols * (h2_pad * h2_pad)

    mean = h2_sum / m
    var = jnp.maximum(h2_sumsq / m - mean * mean, 0.0)  # biased var (PyTorch BN norm)
    # TODO(synk): E[x^2]-E[x]^2 in f32 can cancel badly when |mean| >> std at very
    # large N*H*W; a centered two-pass combine would be more robust at scale.
    inv_std = jax.lax.rsqrt(var + _BN_EPS)

    # Fold BatchNorm into the second conv: (w2 @ h1 - mean)*inv = (w2*inv) @ h1 - mean*inv
    w2s = (w2 * inv_std).astype(jnp.bfloat16)   # (c2, ndf)
    b2 = -mean * inv_std                        # (c2, 1) f32

    # ---- pass 2: h1 recompute + folded-BN conv + LeakyReLU + final 1x1 conv ------
    out_t = pl.pallas_call(
        _forward_kernel,
        grid=(num_tiles,),
        in_specs=[
            pl.BlockSpec((c, tile_m), lambda i: (0, i)),
            pl.BlockSpec(w1b.shape, lambda i: (0, 0)),
            pl.BlockSpec(b1.shape, lambda i: (0, 0)),
            pl.BlockSpec(w2s.shape, lambda i: (0, 0)),
            pl.BlockSpec(b2.shape, lambda i: (0, 0)),
            pl.BlockSpec(w3b.shape, lambda i: (0, 0)),
        ],
        out_specs=pl.BlockSpec((1, tile_m), lambda i: (0, i)),
        out_shape=jax.ShapeDtypeStruct((1, m_pad), jnp.float32),
        compiler_params=pltpu.CompilerParams(
            dimension_semantics=("parallel",),
            vmem_limit_bytes=_VMEM_LIMIT),
    )(x_t, w1b, b1, w2s, b2, w3b)

    out = out_t[0, :m].reshape(n, h, w)
    return out[:, None, :, :]


def init_params(key, input_nc, ndf=64):
    """Deterministic synthetic params; 1x1 conv weights stored as (Cout, Cin)."""
    k1, k2, k3, k4 = jax.random.split(key, 4)
    w1 = jax.random.normal(k1, (ndf, input_nc), jnp.float32) * 0.1
    b1 = jax.random.normal(k2, (ndf, 1), jnp.float32) * 0.1
    w2 = jax.random.normal(k3, (2 * ndf, ndf), jnp.float32) * 0.1
    w3 = jax.random.normal(k4, (1, 2 * ndf), jnp.float32) * 0.1
    return w1, b1, w2, w3


def _reference_mirror(x_nchw, params):
    """Plain-JAX reference mirroring the kernel's bf16-MXU / f32-accumulate pipeline."""
    w1, b1, w2, w3 = params
    n, c, h, w = x_nchw.shape
    m = n * h * w
    bf = jnp.bfloat16
    xt = jnp.transpose(x_nchw, (1, 0, 2, 3)).reshape(c, m)
    h1 = _leaky_relu(jnp.dot(w1.astype(bf), xt.astype(bf),
                             preferred_element_type=jnp.float32) + b1)
    h1b = h1.astype(bf)
    h2 = jnp.dot(w2.astype(bf), h1b, preferred_element_type=jnp.float32)
    mean = jnp.sum(h2, axis=1, keepdims=True) / m
    var = jnp.maximum(jnp.sum(h2 * h2, axis=1, keepdims=True) / m - mean * mean, 0.0)
    inv = jax.lax.rsqrt(var + _BN_EPS)
    w2s = (w2 * inv).astype(bf)
    b2 = -mean * inv
    h2n = _leaky_relu(jnp.dot(w2s, h1b, preferred_element_type=jnp.float32) + b2)
    o = jnp.dot(w3.astype(bf), h2n.astype(bf), preferred_element_type=jnp.float32)
    return o[0].reshape(n, h, w)[:, None]


def _reference_f32(x_nchw, params):
    """Pure-f32 reference of the original PyTorch forward semantics."""
    w1, b1, w2, w3 = params
    n, c, h, w = x_nchw.shape
    m = n * h * w
    xt = jnp.transpose(x_nchw, (1, 0, 2, 3)).reshape(c, m)
    h1 = _leaky_relu(w1 @ xt + b1)
    h2 = w2 @ h1
    mean = jnp.mean(h2, axis=1, keepdims=True)
    var = jnp.mean((h2 - mean) ** 2, axis=1, keepdims=True)
    h2n = _leaky_relu((h2 - mean) * jax.lax.rsqrt(var + _BN_EPS))
    o = w3 @ h2n
    return o[0].reshape(n, h, w)[:, None]


if __name__ == "__main__":
    N, Cin, H, W = 2, 4, 16, 16
    ndf = 64

    key = jax.random.PRNGKey(0)
    kx, kp = jax.random.split(key)
    x = jax.random.normal(kx, (N, Cin, H, W), jnp.float32)
    params = init_params(kp, Cin, ndf)

    # tile_m=384 on the small demo (M = 512 pixels) exercises the multi-tile /
    # dual-accumulator / padding-correction paths; real image sizes use the
    # default 8192-pixel tiles.
    out = jax.block_until_ready(pixel_discriminator(x, params, tile_m=384))

    assert out.shape == (N, 1, H, W), out.shape

    ref_mirror = _reference_mirror(x, params)   # same bf16-MXU pipeline: tight check
    err_m = float(jnp.max(jnp.abs(out - ref_mirror)))
    assert jnp.allclose(out, ref_mirror, atol=2e-3, rtol=2e-3), err_m

    ref_f32 = _reference_f32(x, params)         # original f32 semantics: loose check
    err_f = float(jnp.max(jnp.abs(out - ref_f32)))
    assert jnp.allclose(out, ref_f32, atol=1e-1, rtol=1e-1), err_f

    print("KERNEL_OK")
</pallas_src>

<mosaic_0001>
module attributes {stable_mosaic.version = 11 : i64} {
  func.func @_stats_kernel(%arg0: i32, %arg1: i32, %arg2: memref<4x384xf32, #tpu.memory_space<vmem>>, %arg3: memref<64x4xbf16, #tpu.memory_space<vmem>>, %arg4: memref<64x1xf32, #tpu.memory_space<vmem>>, %arg5: memref<128x64xbf16, #tpu.memory_space<vmem>>, %arg6: memref<1x128x1xf32, #tpu.memory_space<vmem>>, %arg7: memref<1x128x1xf32, #tpu.memory_space<vmem>>) attributes {dimension_semantics = [#tpu.dimension_semantics<parallel>, #tpu.dimension_semantics<arbitrary>], iteration_bounds = array<i64: 2, 1>, scalar_prefetch = 0 : i64, scratch_operands = 0 : i64, tpu.core_type = #tpu.core_type<tc>, window_params = [{transform_indices = @transform_0, window_bounds = array<i64: 4, 384>}, {pipeline_mode = #tpu.pipeline_mode<synchronous>, transform_indices = @transform_1, window_bounds = array<i64: 64, 4>}, {pipeline_mode = #tpu.pipeline_mode<synchronous>, transform_indices = @transform_2, window_bounds = array<i64: 64, 1>}, {pipeline_mode = #tpu.pipeline_mode<synchronous>, transform_indices = @transform_3, window_bounds = array<i64: 128, 64>}, {transform_indices = @transform_4, window_bounds = array<i64: 1, 128, 1>}, {transform_indices = @transform_5, window_bounds = array<i64: 1, 128, 1>}]} {
    %c0_i32 = arith.constant 0 : i32
    %0 = arith.cmpi eq, %arg1, %c0_i32 : i32
    %1 = arith.extui %0 : i1 to i32
    %c0_i32_0 = arith.constant 0 : i32
    %2 = arith.cmpi ne, %1, %c0_i32_0 : i32
    scf.if %2 {
      %cst_25 = arith.constant 0.000000e+00 : f32
      %35 = vector.broadcast %cst_25 : f32 to vector<128x1xf32>
      %c0_26 = arith.constant 0 : index
      %c0_27 = arith.constant 0 : index
      %c0_28 = arith.constant 0 : index
      %36 = vector.load %arg6[%c0_26, %c0_27, %c0_28] : memref<1x128x1xf32, #tpu.memory_space<vmem>>, vector<1x128x1xf32>
      %37 = vector.shape_cast %36 : vector<1x128x1xf32> to vector<128x1xf32>
      %38 = vector.shape_cast %35 : vector<128x1xf32> to vector<1x128x1xf32>
      tpu.vector_store %arg6[%c0_26, %c0_27, %c0_28], %38 {strides = array<i32>} : memref<1x128x1xf32, #tpu.memory_space<vmem>>, vector<1x128x1xf32>,
      %cst_29 = arith.constant 0.000000e+00 : f32
      %39 = vector.broadcast %cst_29 : f32 to vector<128x1xf32>
      %c0_30 = arith.constant 0 : index
      %c0_31 = arith.constant 0 : index
      %c0_32 = arith.constant 0 : index
      %40 = vector.load %arg7[%c0_30, %c0_31, %c0_32] : memref<1x128x1xf32, #tpu.memory_space<vmem>>, vector<1x128x1xf32>
      %41 = vector.shape_cast %40 : vector<1x128x1xf32> to vector<128x1xf32>
      %42 = vector.shape_cast %39 : vector<128x1xf32> to vector<1x128x1xf32>
      tpu.vector_store %arg7[%c0_30, %c0_31, %c0_32], %42 {strides = array<i32>} : memref<1x128x1xf32, #tpu.memory_space<vmem>>, vector<1x128x1xf32>,
    } else {
    }
    %c0 = arith.constant 0 : index
    %c0_1 = arith.constant 0 : index
    %3 = vector.load %arg2[%c0, %c0_1] : memref<4x384xf32, #tpu.memory_space<vmem>>, vector<4x384xf32>
    %4 = arith.truncf %3 : vector<4x384xf32> to vector<4x384xbf16>
    %c0_2 = arith.constant 0 : index
    %c0_3 = arith.constant 0 : index
    %5 = vector.load %arg3[%c0_2, %c0_3] : memref<64x4xbf16, #tpu.memory_space<vmem>>, vector<64x4xbf16>
    %cst = arith.constant dense<0.000000e+00> : vector<64x384xf32>
    %6 = tpu.matmul %5, %4, %cst {dimension_numbers = #tpu.dot_dimension_numbers<[1], [0], [0], [1], [0, 0, 1, 1], [], []>} : vector<64x4xbf16>, vector<4x384xbf16>, vector<64x384xf32> -> vector<64x384xf32>
    %c0_4 = arith.constant 0 : index
    %c0_5 = arith.constant 0 : index
    %7 = vector.load %arg4[%c0_4, %c0_5] : memref<64x1xf32, #tpu.memory_space<vmem>>, vector<64x1xf32>
    %8 = vector.broadcast %7 : vector<64x1xf32> to vector<64x384xf32>
    %9 = arith.addf %6, %8 : vector<64x384xf32>
    %cst_6 = arith.constant 0.000000e+00 : f32
    %10 = vector.broadcast %cst_6 : f32 to vector<64x384xf32>
    %11 = arith.cmpf oge, %9, %10 : vector<64x384xf32>
    %cst_7 = arith.constant 2.000000e-01 : f32
    %12 = vector.broadcast %cst_7 : f32 to vector<64x384xf32>
    %13 = arith.mulf %12, %9 : vector<64x384xf32>
    %14 = arith.select %11, %9, %13 : vector<64x384xi1>, vector<64x384xf32>
    %c0_8 = arith.constant 0 : index
    %c0_9 = arith.constant 0 : index
    %15 = vector.load %arg5[%c0_8, %c0_9] : memref<128x64xbf16, #tpu.memory_space<vmem>>, vector<128x64xbf16>
    %16 = arith.truncf %14 : vector<64x384xf32> to vector<64x384xbf16>
    %cst_10 = arith.constant dense<0.000000e+00> : vector<128x384xf32>
    %17 = tpu.matmul %15, %16, %cst_10 {dimension_numbers = #tpu.dot_dimension_numbers<[1], [0], [0], [1], [0, 0, 1, 1], [], []>} : vector<128x64xbf16>, vector<64x384xbf16>, vector<128x384xf32> -> vector<128x384xf32>
    %c0_11 = arith.constant 0 : index
    %c0_12 = arith.constant 0 : index
    %c0_13 = arith.constant 0 : index
    %18 = vector.load %arg6[%c0_11, %c0_12, %c0_13] : memref<1x128x1xf32, #tpu.memory_space<vmem>>, vector<1x128x1xf32>
    %19 = vector.shape_cast %18 : vector<1x128x1xf32> to vector<128x1xf32>
    %cst_14 = arith.constant dense<0.000000e+00> : vector<128xf32>
    %20 = vector.multi_reduction <add>, %17, %cst_14 [1] : vector<128x384xf32> to vector<128xf32>
    %21 = vector.shape_cast %20 : vector<128xf32> to vector<128x1xf32>
    %22 = arith.addf %19, %21 : vector<128x1xf32>
    %c0_15 = arith.constant 0 : index
    %c0_16 = arith.constant 0 : index
    %c0_17 = arith.constant 0 : index
    %23 = vector.load %arg6[%c0_15, %c0_16, %c0_17] : memref<1x128x1xf32, #tpu.memory_space<vmem>>, vector<1x128x1xf32>
    %24 = vector.shape_cast %23 : vector<1x128x1xf32> to vector<128x1xf32>
    %25 = vector.shape_cast %22 : vector<128x1xf32> to vector<1x128x1xf32>
    tpu.vector_store %arg6[%c0_15, %c0_16, %c0_17], %25 {strides = array<i32>} : memref<1x128x1xf32, #tpu.memory_space<vmem>>, vector<1x128x1xf32>,
    %c0_18 = arith.constant 0 : index
    %c0_19 = arith.constant 0 : index
    %c0_20 = arith.constant 0 : index
    %26 = vector.load %arg7[%c0_18, %c0_19, %c0_20] : memref<1x128x1xf32, #tpu.memory_space<vmem>>, vector<1x128x1xf32>
    %27 = vector.shape_cast %26 : vector<1x128x1xf32> to vector<128x1xf32>
    %28 = arith.mulf %17, %17 : vector<128x384xf32>
    %cst_21 = arith.constant dense<0.000000e+00> : vector<128xf32>
    %29 = vector.multi_reduction <add>, %28, %cst_21 [1] : vector<128x384xf32> to vector<128xf32>
    %30 = vector.shape_cast %29 : vector<128xf32> to vector<128x1xf32>
    %31 = arith.addf %27, %30 : vector<128x1xf32>
    %c0_22 = arith.constant 0 : index
    %c0_23 = arith.constant 0 : index
    %c0_24 = arith.constant 0 : index
    %32 = vector.load %arg7[%c0_22, %c0_23, %c0_24] : memref<1x128x1xf32, #tpu.memory_space<vmem>>, vector<1x128x1xf32>
    %33 = vector.shape_cast %32 : vector<1x128x1xf32> to vector<128x1xf32>
    %34 = vector.shape_cast %31 : vector<128x1xf32> to vector<1x128x1xf32>
    tpu.vector_store %arg7[%c0_22, %c0_23, %c0_24], %34 {strides = array<i32>} : memref<1x128x1xf32, #tpu.memory_space<vmem>>, vector<1x128x1xf32>,
    return
  }
  func.func @transform_0(%arg0: i32, %arg1: i32) -> (i32, i32) {
    %c1_i32 = arith.constant 1 : i32
    %0 = arith.muli %arg0, %c1_i32 : i32
    %1 = arith.addi %0, %arg1 : i32
    %c0_i32 = arith.constant 0 : i32
    %c0_i32_0 = arith.constant 0 : i32
    return %c0_i32, %1 : i32, i32
  }
  func.func @transform_1(%arg0: i32, %arg1: i32) -> (i32, i32) {
    %c0_i32 = arith.constant 0 : i32
    %c0_i32_0 = arith.constant 0 : i32
    %c0_i32_1 = arith.constant 0 : i32
    return %c0_i32, %c0_i32_0 : i32, i32
  }
  func.func @transform_2(%arg0: i32, %arg1: i32) -> (i32, i32) {
    %c0_i32 = arith.constant 0 : i32
    %c0_i32_0 = arith.constant 0 : i32
    %c0_i32_1 = arith.constant 0 : i32
    return %c0_i32, %c0_i32_0 : i32, i32
  }
  func.func @transform_3(%arg0: i32, %arg1: i32) -> (i32, i32) {
    %c0_i32 = arith.constant 0 : i32
    %c0_i32_0 = arith.constant 0 : i32
    %c0_i32_1 = arith.constant 0 : i32
    return %c0_i32, %c0_i32_0 : i32, i32
  }
  func.func @transform_4(%arg0: i32, %arg1: i32) -> (i32, i32, i32) {
    %c0_i32 = arith.constant 0 : i32
    %c0_i32_0 = arith.constant 0 : i32
    %c0_i32_1 = arith.constant 0 : i32
    return %arg0, %c0_i32, %c0_i32_0 : i32, i32, i32
  }
  func.func @transform_5(%arg0: i32, %arg1: i32) -> (i32, i32, i32) {
    %c0_i32 = arith.constant 0 : i32
    %c0_i32_0 = arith.constant 0 : i32
    %c0_i32_1 = arith.constant 0 : i32
    return %arg0, %c0_i32, %c0_i32_0 : i32, i32, i32
  }
}

</mosaic_0001>

<bundles_post_ra>
// kernel: tpu_custom_call.1
= control target key start
LH: loop header
LB: loop body
LE: loop exit
PB: predicated region body
PF: predicated region fallthrough
CT: control target
= control target key end

     0   :  { %s1378_s18 = smov 0   ;;  %s1380_s19 = smov 0   ;;  %s1764_s0 = inlined_call_operand.vmem [shape: f32[4,768], index: 0, kind: input, shape index: {}]   ;;  %s1765_s1 = inlined_call_operand.vmem [shape: bf16[64,4], index: 1, kind: input, shape index: {}]   ;;  %s1766_s2 = inlined_call_operand.vmem [shape: f32[64,1], index: 2, kind: input, shape index: {}]   ;;  %s1767_s3 = inlined_call_operand.vmem [shape: bf16[128,64], index: 3, kind: input, shape index: {}]   ;;  %s1768_s4 = inlined_call_operand.vmem [shape: f32[2,128,1], index: 4, kind: output, shape index: {0}]   ;;  %s1769_s5 = inlined_call_operand.vmem [shape: f32[2,128,1], index: 5, kind: output, shape index: {1}]  }
   0x1   :  { %s1382_s20 = smov 0  }
   0x2 LB: > { %s28_s21 = sadd.s32 1, %s1340_s19  ;;  %p1184_p0 = scmp.ge.s32.totalorder %s1344_s20, 1  ;;  %s1344_s20 = sphi %s1382_s20, %s16_s20   ;;  %s1340_s19 = sphi %s1380_s19, %s1771_s19   ;;  %s1336_s18 = sphi %s1378_s18, %s1770_s18  }
   0x3   : > { %p30_p1 = scmp.ge.s32.totalorder %s28_s21, 2  ;;  %p207_p2 = scmp.lt.s32.totalorder %s1344_s20, 3 }
   0x5   : > { %s1773_s21 = smov (%p30_p1, %s28_s21), 0  ;;  %p208_p3 = pnand %p1184_p0, %p207_p2 }
   0x6   : > { %s242_s22 = smul.u32 (!%p208_p3), 3, %s1336_s18  ;;  %p249_p5 = scmp.lt.s32.totalorder (!%p208_p3), %s1336_s18, 1 }
   0x7   : > { %211 = sbr.rel (%p208_p3) target bundleno = 697 (0x2b9), region = 36 }
   0x8   : > { %p243_p4 = scmp.lt.s32.totalorder (!%p208_p3), %s242_s22, 5 }
   0xc   : > { %v327_v0 = vld [vmem:[%s1766_s2 + $0x30] sm:$0xff]  ;;  %v1346_v1 = vmov 0   ;;  %v325_v2 = vld [vmem:[%s1766_s2 + $0x20] sm:$0xff]  ;;  %s1775_s22 = smov (!%p243_p4, %s242_s22), 5  ;;  %v328_v3 = vld [vmem:[%s1766_s2 + $0x38] sm:$0xff]  ;;  %vm402_vm0 = vcmask 1041408  }
   0xd   : > { %1319 = vset.pattern.permute.xlu0 %v1346_v1  ;;  %1320 = vset.pattern.permute.xlu1 %v1346_v1  ;;  %s1185_s27 = sshll.u32 %s1775_s22, 2  ;;  %v326_v4 = vld [vmem:[%s1766_s2 + $0x28] sm:$0xff]  ;;  %v321_v7 = vld [vmem:[%s1766_s2] sm:$0xff]  ;;  %v1281_v16 = vld [vmem:[%s1765_s1 + $0x18] sm:$0xff]  ;;  %vm389_vm1 = vcmask 31744   ;;  %s1777_s18 = smov (!%p249_p5, %s1336_s18), 1 }
   0xe   : > { %361 = vperm.xlu0 %1319, %v327_v0   ;;  %351 = vperm.xlu1 %1320, %v325_v2   ;;  %s246_s30 = scalar_lea.vmem %s1764_s0, %s1185_s27  ;;  %v322_v8 = vld [vmem:[%s1766_s2 + $0x8] sm:$0xff]  ;;  %v1278_v14 = vld [vmem:[%s1765_s1] sm:$0xff]  ;;  %v323_v19 = vld [vmem:[%s1766_s2 + $0x10] sm:$0xff]  ;;  %s1276_s25 = sshll.u32 %s1777_s18, 7 }
   0xf   : > { %1321 = vset.pattern.permute.xlu2 %v1346_v1  ;;  %v297_v5 = vld [vmem:[%s246_s30] sm:$0xff]  ;;  %v298_v6 = vld [vmem:[%s246_s30 + $0x8] sm:$0xf]  ;;  %v1280_v22 = vld [vmem:[%s1765_s1 + $0x10] sm:$0xff]  ;;  %s1554_s28 = scalar_lea.vmem %s1768_s4, %s1276_s25  ;;  %s1603_s6 = scalar_lea.vmem %s1769_s5, %s1276_s25 }
  0x10   : > { %301 = vst [vmem:[#allocation1] ss:$2 sm:$0xff] %v297_v5  ;;  %v1279_v17 = vld [vmem:[%s1765_s1 + $0x8] sm:$0xff]  ;;  %341 = vperm.xlu2 %1321, %v323_v19   ;;  %v324_v23 = vld [vmem:[%s1766_s2 + $0x18] sm:$0xff] }
  0x11   : > { %303 = vst [vmem:[#allocation1 + $0x10] ss:$2 sm:$0xff] %v298_v6 }
  0x16   : > { %366 = vperm.xlu0 %1319, %v328_v3   ;;  %356 = vperm.xlu1 %1320, %v326_v4  }
  0x17   : > { %v304_v9 = vld.sshfl [vmem:[#allocation1] sm:$0xff pattern:$0x75316420]  ;;  %v305_v10 = vld.sshfl [vmem:[#allocation1 + $0x8] sm:$0xff pattern:$0x75316420] }
  0x18   : > { %v310_v11 = vpack.c.bf16 %v304_v9, %v304_v9  ;;  %v311_v12 = vpack.c.bf16 %v305_v10, %v305_v10  ;;  %v306_v18 = vld.sshfl [vmem:[#allocation1 + $0x10] sm:$0xff pattern:$0x75316420]  ;;  %346 = vperm.xlu2 %1321, %v324_v23  }
  0x19   : > { %v312_v20 = vpack.c.bf16 %v306_v18, %v306_v18 }
  0x1a   : > { %v404_v13 = vsel %vm402_vm0, %v310_v11, 0  ;;  %v407_v15 = vsel %vm402_vm0, %v311_v12, 0 }
  0x1b   : > { %419 = vmatpush.bf16.msra.mxu2 %v404_v13  ;;  %1290 = vmatpush.bf16.msra.mxu3 %v404_v13  ;;  %v410_v21 = vsel %vm402_vm0, %v312_v20, 0 }
  0x1c   : > { %1291 = vmatpush.bf16.msra.mxu1 %v407_v15  ;;  %448 = vmatpush.bf16.msra.mxu0 %v407_v15 }
  0x1e   : > { %331 = vperm.xlu0 %1319, %v321_v7   ;;  %336 = vperm.xlu1 %1320, %v322_v8  }
  0x1f   : > { %1292 = vmatpush.bf16.msrb.mxu2 %v407_v15  ;;  %1209 = vmatmul.msk.bf16.vlgmr.msra.gmra.mxu3 %vm389_vm1, %v1281_v16 }
  0x20   : > { %1206 = vmatmul.msk.bf16.vlgmr.msra.gmra.mxu2 %vm389_vm1, %v1278_v14  ;;  %1211 = vmatmul.msk.bf16.vlgmr.msra.gmra.mxu1 %vm389_vm1, %v1279_v17 }
  0x21   : > { %1210 = vmatmul.msk.bf16.vlgmr.msra.gmra.mxu0 %vm389_vm1, %v1278_v14 }
  0x23   : > { %477 = vmatpush.bf16.msra.mxu2 %v410_v21 }
  0x30   : > { %1207 = vmatmul.msk.bf16.gmra.mxu2 %vm389_vm1, %v1279_v17 }
  0x40   : > { %1208 = vmatmul.msk.bf16.gmra.mxu2 %vm389_vm1, %v1280_v22 }
  0x50   : > { %1212 = vmatmul.msk.bf16.vlgmr.msrb.gmra.mxu2 %vm389_vm1, %v1280_v22 }
  0x60   : > { %1213 = vmatmul.msk.bf16.gmra.mxu2 %vm389_vm1, %v1281_v16 }
  0x6a   : > { %v1461_v40 = vpop.permute.xlu2 %341 }
  0x70   : > { %1214 = vmatmul.msk.bf16.vlgmr.msra.gmra.mxu2 %vm389_vm1, %v1278_v14 }
  0x72   : > { %v1465_v43 = vpop.permute.xlu2 %346 }
  0x80   : > { %1215 = vmatmul.msk.bf16.gmra.mxu2 %vm389_vm1, %v1279_v17  ;;  %v1452_v24 = vpop.permute.xlu0 %361  ;;  %v1459_v38 = vpop.permute.xlu1 %351 }
  0x88   : > { %v1456_v28 = vpop.permute.xlu0 %366  ;;  %v1463_v41 = vpop.permute.xlu1 %356 }
  0x90   : > { %1216 = vmatmul.msk.bf16.gmra.mxu2 %vm389_vm1, %v1280_v22  ;;  %v1469_v46 = vpop.permute.xlu1 %336  ;;  %v1473_v51 = vpop.permute.xlu0 %331 }
  0x9d   : > { %v455_v13 = vpop.f32.mrf.mxu1 }
  0x9e   : > { %v456_v22 = vadd.f32 %v455_v13, %v1461_v40 }
  0xa0   : > { %1217 = vmatmul.msk.bf16.gmra.mxu2 %vm389_vm1, %v1281_v16  ;;  %v450_v16 = vpop.f32.mrf.mxu0  ;;  %vm506_vm14 = vcmp.ge.f32.partialorder %v456_v22, 0.0 }
  0xa2   : > { %v436_v26 = vpop.f32.mrf.mxu3 }
  0xa3   : > { %v421_v25 = vpop.f32.mrf.mxu2  ;;  %v437_v27 = vadd.f32 %v436_v26, %v1452_v24 }
  0xa4   : > { %v422_v55 = vadd.f32 %v421_v25, %v1473_v51 }
  0xa5   : > { %v541_v29 = vmul.f32 0.2, %v437_v27  ;;  %vm517_vm2 = vcmp.ge.f32.partialorder %v437_v27, 0.0 }
  0xa6   : > { %v523_v63 = vmul.f32 0.2, %v422_v55  ;;  %vm499_vm9 = vcmp.ge.f32.partialorder %v422_v55, 0.0 }
  0xa7   : > { %v565_v34 = vsel %vm517_vm2, %v437_v27, %v541_v29  ;;  %v457_v27 = vpop.f32.mrf.mxu1  ;;  %v530_v29 = vmul.f32 0.2, %v456_v22  ;;  %vm639_vm2 = vcmask 523264  }
  0xa8   : > { %v547_v3 = vsel %vm499_vm9, %v422_v55, %v523_v63  ;;  %v1283_v55 = vld [vmem:[%s1767_s3 + $0x8] sm:$0xff] }
  0xaa   : > { %v438_v31 = vpop.f32.mrf.mxu3 }
  0xab   : > { %v423_v30 = vpop.f32.mrf.mxu2  ;;  %v439_v32 = vadd.f32 %v438_v31, %v1456_v28  ;;  %v458_v31 = vadd.f32 %v457_v27, %v1465_v43 }
  0xac   : > { %v424_v52 = vadd.f32 %v423_v30, %v1469_v46  ;;  %v451_v30 = vadd.f32 %v450_v16, %v1473_v51  ;;  %v1286_v16 = vld [vmem:[%s1767_s3 + $0x20] sm:$0xff] }
  0xad   : > { %v544_v33 = vmul.f32 0.2, %v439_v32  ;;  %vm520_vm3 = vcmp.ge.f32.partialorder %v439_v32, 0.0  ;;  %vm509_vm15 = vcmp.ge.f32.partialorder %v458_v31, 0.0 }
  0xae   : > { %v526_v60 = vmul.f32 0.2, %v424_v52  ;;  %vm502_vm8 = vcmp.ge.f32.partialorder %v424_v52, 0.0  ;;  %vm500_vm0 = vcmp.ge.f32.partialorder %v451_v30, 0.0 }
  0xaf   : > { %v568_v35 = vsel %vm520_vm3, %v439_v32, %v544_v33  ;;  %v452_v32 = vpop.f32.mrf.mxu0 }
  0xb0   : > { %v596_v36 = vpack.c.bf16 %v568_v35, %v565_v34  ;;  %v550_v2 = vsel %vm502_vm8, %v424_v52, %v526_v60  ;;  %v453_v33 = vadd.f32 %v452_v32, %v1469_v46  ;;  %v533_v34 = vmul.f32 0.2, %v458_v31  ;;  %v1282_v52 = vld [vmem:[%s1767_s3] sm:$0xff] }
  0xb1   : > { %v587_v4 = vpack.c.bf16 %v550_v2, %v547_v3  ;;  %v524_v35 = vmul.f32 0.2, %v451_v30 }
  0xb2   : > { %668 = vmatpush.bf16.msrb.mxu3 %v596_v36  ;;  %v527_v36 = vmul.f32 0.2, %v453_v33  ;;  %vm503_vm1 = vcmp.ge.f32.partialorder %v453_v33, 0.0 }
  0xb3   : > { %v426_v37 = vpop.f32.mrf.mxu2 }
  0xb4   : > { %v427_v48 = vadd.f32 %v426_v37, %v1461_v40  ;;  %v554_v37 = vsel %vm506_vm14, %v456_v22, %v530_v29 }
  0xb6   : > { %v529_v56 = vmul.f32 0.2, %v427_v48  ;;  %vm505_vm7 = vcmp.ge.f32.partialorder %v427_v48, 0.0 }
  0xb8   : > { %v553_v0 = vsel %vm505_vm7, %v427_v48, %v529_v56 }
  0xbb   : > { %v428_v39 = vpop.f32.mrf.mxu2 }
  0xbc   : > { %v429_v45 = vadd.f32 %v428_v39, %v1465_v43  ;;  %v557_v39 = vsel %vm509_vm15, %v458_v31, %v533_v34 }
  0xbe   : > { %v532_v53 = vmul.f32 0.2, %v429_v45  ;;  %vm508_vm6 = vcmp.ge.f32.partialorder %v429_v45, 0.0 }
  0xc0   : > { %v556_v61 = vsel %vm508_vm6, %v429_v45, %v532_v53  ;;  %v548_v45 = vsel %vm500_vm0, %v451_v30, %v524_v35 }
  0xc1   : > { %v590_v1 = vpack.c.bf16 %v556_v61, %v553_v0 }
  0xc3   : > { %v431_v42 = vpop.f32.mrf.mxu2 }
  0xc4   : > { %v432_v44 = vadd.f32 %v431_v42, %v1459_v38 }
  0xc6   : > { %v535_v49 = vmul.f32 0.2, %v432_v44  ;;  %vm511_vm4 = vcmp.ge.f32.partialorder %v432_v44, 0.0 }
  0xc8   : > { %v559_v57 = vsel %vm511_vm4, %v432_v44, %v535_v49  ;;  %v591_v44 = vpack.c.bf16 %v557_v39, %v554_v37 }
  0xcb   : > { %v433_v47 = vpop.f32.mrf.mxu2 }
  0xcc   : > { %v434_v50 = vadd.f32 %v433_v47, %v1463_v41  ;;  %v551_v47 = vsel %vm503_vm1, %v453_v33, %v527_v36 }
  0xcd   : > { %v588_v48 = vpack.c.bf16 %v551_v47, %v548_v45 }
  0xce   : > { %v538_v54 = vmul.f32 0.2, %v434_v50  ;;  %vm514_vm5 = vcmp.ge.f32.partialorder %v434_v50, 0.0 }
  0xd0   : > { %v562_v58 = vsel %vm514_vm5, %v434_v50, %v538_v54 }
  0xd1   : > { %v593_v59 = vpack.c.bf16 %v562_v58, %v559_v57 }
  0xd3   : > { %v460_v62 = vpop.f32.mrf.mxu2  ;;  %669 = vmatpush.bf16.msrb.mxu3 %v593_v59 }
  0xd4   : > { %v461_v10 = vadd.f32 %v460_v62, %v1459_v38 }
  0xd6   : > { %v536_v17 = vmul.f32 0.2, %v461_v10  ;;  %vm512_vm13 = vcmp.ge.f32.partialorder %v461_v10, 0.0 }
  0xd7   : > { %670 = vmatpush.bf16.msrb.mxu3 %v590_v1 }
  0xd8   : > { %v560_v25 = vsel %vm512_vm13, %v461_v10, %v536_v17  ;;  %v1287_v17 = vld [vmem:[%s1767_s3 + $0x28] sm:$0xff] }
  0xdb   : > { %v462_v5 = vpop.f32.mrf.mxu2  ;;  %671 = vmatpush.bf16.msrb.mxu3 %v587_v4 }
  0xdc   : > { %v463_v8 = vadd.f32 %v462_v5, %v1463_v41 }
  0xde   : > { %v539_v14 = vmul.f32 0.2, %v463_v8  ;;  %vm515_vm12 = vcmp.ge.f32.partialorder %v463_v8, 0.0  ;;  %1250 = vmatmul.msk.bf16.vlgmr.msrb.gmra.mxu3 %vm639_vm2, %v1282_v52 }
  0xe0   : > { %v563_v21 = vsel %vm515_vm12, %v463_v8, %v539_v14 }
  0xe1   : > { %v594_v26 = vpack.c.bf16 %v563_v21, %v560_v25 }
  0xe3   : > { %v465_v6 = vpop.f32.mrf.mxu2 }
  0xe4   : > { %v466_v7 = vadd.f32 %v465_v6, %v1452_v24 }
  0xe6   : > { %v542_v11 = vmul.f32 0.2, %v466_v7  ;;  %vm518_vm10 = vcmp.ge.f32.partialorder %v466_v7, 0.0 }
  0xe8   : > { %v566_v18 = vsel %vm518_vm10, %v466_v7, %v542_v11 }
  0xeb   : > { %v467_v9 = vpop.f32.mrf.mxu2 }
  0xec   : > { %v468_v12 = vadd.f32 %v467_v9, %v1456_v28 }
  0xee   : > { %v545_v15 = vmul.f32 0.2, %v468_v12  ;;  %vm521_vm11 = vcmp.ge.f32.partialorder %v468_v12, 0.0  ;;  %1251 = vmatmul.msk.bf16.gmra.mxu3 %vm639_vm2, %v1283_v55 }
  0xf0   : > { %v569_v19 = vsel %vm521_vm11, %v468_v12, %v545_v15  ;;  %vm264_vm11 = vcmask 7168  }
  0xf1   : > { %v597_v20 = vpack.c.bf16 %v569_v19, %v566_v18  ;;  %v1288_v18 = vld [vmem:[%s1767_s3 + $0x30] sm:$0xff]  ;;  %v1289_v19 = vld [vmem:[%s1767_s3 + $0x38] sm:$0xff] }
  0xf3   : > { %v1482_v23 = vpop.f32.mrf.mxu2  ;;  %717 = vmatpush.bf16.msrb.mxu0 %v597_v20 }
  0xf7   : > { %718 = vmatpush.bf16.msrb.mxu0 %v594_v26 }
  0xfb   : > { %v481_v42 = vpop.f32.mrf.mxu2  ;;  %719 = vmatpush.bf16.msrb.mxu0 %v591_v44 }
  0xff   : > { %720 = vmatpush.bf16.msrb.mxu0 %v588_v48 }
 0x102   : > { %1258 = vmatmul.msk.bf16.vlgmr.msrb.gmra.mxu0 %vm639_vm2, %v1282_v52 }
 0x103   : > { %v484_v49 = vpop.f32.mrf.mxu2 }
 0x104   : > { %v485_v2 = vadd.f32 %v484_v49, %v1461_v40  ;;  %v480_v40 = vadd.f32 %v1482_v23, %v1473_v51  ;;  %v1285_v51 = vld [vmem:[%s1767_s3 + $0x18] sm:$0xff] }
 0x106   : > { %vm507_vm8 = vcmp.ge.f32.partialorder %v485_v2, 0.0  ;;  %vm501_vm10 = vcmp.ge.f32.partialorder %v480_v40, 0.0 }
 0x10b   : > { %v486_v50 = vpop.f32.mrf.mxu2 }
 0x10c   : > { %v487_v63 = vadd.f32 %v486_v50, %v1465_v43  ;;  %v531_v43 = vmul.f32 0.2, %v485_v2 }
 0x10e   : > { %v534_v5 = vmul.f32 0.2, %v487_v63  ;;  %vm510_vm7 = vcmp.ge.f32.partialorder %v487_v63, 0.0  ;;  %v555_v11 = vsel %vm507_vm8, %v485_v2, %v531_v43 }
 0x110   : > { %v558_v10 = vsel %vm510_vm7, %v487_v63, %v534_v5 }
 0x111   : > { %v592_v12 = vpack.c.bf16 %v558_v10, %v555_v11 }
 0x112   : > { %1259 = vmatmul.msk.bf16.gmra.mxu0 %vm639_vm2, %v1283_v55 }
 0x113   : > { %v489_v53 = vpop.f32.mrf.mxu2 }
 0x114   : > { %v490_v60 = vadd.f32 %v489_v53, %v1459_v38 }
 0x116   : > { %v537_v3 = vmul.f32 0.2, %v490_v60  ;;  %vm513_vm6 = vcmp.ge.f32.partialorder %v490_v60, 0.0 }
 0x118   : > { %v561_v7 = vsel %vm513_vm6, %v490_v60, %v537_v3 }
 0x11b   : > { %v491_v54 = vpop.f32.mrf.mxu2 }
 0x11c   : > { %v492_v58 = vadd.f32 %v491_v54, %v1463_v41  ;;  %v1284_v41 = vld [vmem:[%s1767_s3 + $0x10] sm:$0xff] }
 0x11d   : > { %1252 = vmatmul.msk.bf16.gmra.mxu3 %vm639_vm2, %v1284_v41 }
 0x11e   : > { %v540_v0 = vmul.f32 0.2, %v492_v58  ;;  %vm516_vm5 = vcmp.ge.f32.partialorder %v492_v58, 0.0 }
 0x120   : > { %v564_v6 = vsel %vm516_vm5, %v492_v58, %v540_v0 }
 0x121   : > { %v595_v8 = vpack.c.bf16 %v564_v6, %v561_v7 }
 0x122   : > { %1260 = vmatmul.msk.bf16.gmra.mxu0 %vm639_vm2, %v1284_v41 }
 0x123   : > { %v494_v56 = vpop.f32.mrf.mxu2 }
 0x124   : > { %v495_v57 = vadd.f32 %v494_v56, %v1452_v24 }
 0x126   : > { %v543_v61 = vmul.f32 0.2, %v495_v57  ;;  %vm519_vm3 = vcmp.ge.f32.partialorder %v495_v57, 0.0 }
 0x128   : > { %v567_v4 = vsel %vm519_vm3, %v495_v57, %v543_v61 }
 0x12b   : > { %v496_v59 = vpop.f32.mrf.mxu2 }
 0x12c   : > { %v497_v62 = vadd.f32 %v496_v59, %v1456_v28  ;;  %v482_v28 = vadd.f32 %v481_v42, %v1469_v46  ;;  %v525_v46 = vmul.f32 0.2, %v480_v40 }
 0x12d   : > { %1253 = vmatmul.msk.bf16.gmra.mxu3 %vm639_vm2, %v1285_v51 }
 0x12e   : > { %v546_v1 = vmul.f32 0.2, %v497_v62  ;;  %vm522_vm4 = vcmp.ge.f32.partialorder %v497_v62, 0.0  ;;  %v528_v9 = vmul.f32 0.2, %v482_v28  ;;  %vm504_vm9 = vcmp.ge.f32.partialorder %v482_v28, 0.0 }
 0x12f   : > { %v549_v14 = vsel %vm501_vm10, %v480_v40, %v525_v46 }
 0x130   : > { %v570_v24 = vsel %vm522_vm4, %v497_v62, %v546_v1  ;;  %v552_v13 = vsel %vm504_vm9, %v482_v28, %v528_v9 }
 0x131   : > { %v598_v38 = vpack.c.bf16 %v570_v24, %v567_v4  ;;  %v589_v15 = vpack.c.bf16 %v552_v13, %v549_v14 }
 0x132   : > { %1261 = vmatmul.msk.bf16.gmra.mxu0 %vm639_vm2, %v1285_v51 }
 0x133   : > { %766 = vmatpush.bf16.msrb.mxu1 %v598_v38 }
 0x137   : > { %767 = vmatpush.bf16.msrb.mxu1 %v595_v8 }
 0x13b   : > { %768 = vmatpush.bf16.msrb.mxu1 %v592_v12 }
 0x13d   : > { %1254 = vmatmul.msk.bf16.gmra.mxu3 %vm639_vm2, %v1286_v16 }
 0x13f   : > { %769 = vmatpush.bf16.msrb.mxu1 %v589_v15 }
 0x142   : > { %1266 = vmatmul.msk.bf16.vlgmr.msrb.gmra.mxu1 %vm639_vm2, %v1282_v52  ;;  %1262 = vmatmul.msk.bf16.gmra.mxu0 %vm639_vm2, %v1286_v16 }
 0x14d   : > { %1255 = vmatmul.msk.bf16.gmra.mxu3 %vm639_vm2, %v1287_v17 }
 0x152   : > { %1267 = vmatmul.msk.bf16.gmra.mxu1 %vm639_vm2, %v1283_v55  ;;  %1263 = vmatmul.msk.bf16.gmra.mxu0 %vm639_vm2, %v1287_v17 }
 0x15d   : > { %1256 = vmatmul.msk.bf16.gmra.mxu3 %vm639_vm2, %v1288_v18 }
 0x161   : > { %v673_v21 = vpop.f32.mrf.mxu3 }
 0x162   : > { %1268 = vmatmul.msk.bf16.gmra.mxu1 %vm639_vm2, %v1284_v41  ;;  %1264 = vmatmul.msk.bf16.gmra.mxu0 %vm639_vm2, %v1288_v18  ;;  %v940_v32 = vmul.f32 %v673_v21, %v673_v21 }
 0x169   : > { %v675_v23 = vpop.f32.mrf.mxu3 }
 0x16a   : > { %v943_v48 = vmul.f32 %v675_v23, %v675_v23 }
 0x16d   : > { %1257 = vmatmul.msk.bf16.gmra.mxu3 %vm639_vm2, %v1289_v19 }
 0x171   : > { %v678_v26 = vpop.f32.mrf.mxu3 }
 0x172   : > { %1269 = vmatmul.msk.bf16.gmra.mxu1 %vm639_vm2, %v1285_v51  ;;  %1265 = vmatmul.msk.bf16.gmra.mxu0 %vm639_vm2, %v1289_v19  ;;  %v946_v57 = vmul.f32 %v678_v26, %v678_v26 }
 0x179   : > { %v680_v29 = vpop.f32.mrf.mxu3 }
 0x17a   : > { %v949_v41 = vmul.f32 %v680_v29, %v680_v29 }
 0x17f   : > { %v722_v20 = vpop.f32.mrf.mxu0 }
 0x180   : > { %v827_v30 = vadd.f32 %v722_v20, %v673_v21  ;;  %v941_v33 = vmul.f32 %v722_v20, %v722_v20 }
 0x182   : > { %1270 = vmatmul.msk.bf16.gmra.mxu1 %vm639_vm2, %v1286_v16  ;;  %v988_v39 = vadd.f32 %v941_v33, %v940_v32 }
 0x187   : > { %v724_v22 = vpop.f32.mrf.mxu0 }
 0x188   : > { %v831_v42 = vadd.f32 %v724_v22, %v675_v23  ;;  %v944_v49 = vmul.f32 %v724_v22, %v724_v22 }
 0x18a   : > { %v992_v55 = vadd.f32 %v944_v49, %v943_v48 }
 0x18f   : > { %v727_v25 = vpop.f32.mrf.mxu0 }
 0x190   : > { %v835_v50 = vadd.f32 %v727_v25, %v678_v26  ;;  %v947_v58 = vmul.f32 %v727_v25, %v727_v25 }
 0x192   : > { %1271 = vmatmul.msk.bf16.gmra.mxu1 %vm639_vm2, %v1287_v17  ;;  %v996_v62 = vadd.f32 %v947_v58, %v946_v57 }
 0x197   : > { %v729_v27 = vpop.f32.mrf.mxu0 }
 0x198   : > { %v839_v63 = vadd.f32 %v729_v27, %v680_v29  ;;  %v950_v24 = vmul.f32 %v729_v27, %v729_v27 }
 0x19a   : > { %v1000_v6 = vadd.f32 %v950_v24, %v949_v41 }
 0x19f   : > { %v732_v35 = vpop.f32.mrf.mxu0 }
 0x1a0   : > { %v683_v36 = vpop.f32.mrf.mxu3  ;;  %v953_v28 = vmul.f32 %v732_v35, %v732_v35 }
 0x1a1   : > { %v952_v38 = vmul.f32 %v683_v36, %v683_v36  ;;  %v843_v11 = vadd.f32 %v732_v35, %v683_v36 }
 0x1a2   : > { %1272 = vmatmul.msk.bf16.gmra.mxu1 %vm639_vm2, %v1288_v18 }
 0x1a3   : > { %v1004_v40 = vadd.f32 %v953_v28, %v952_v38  ;;  %v1347_v28 = vmov 0.0  }
 0x1a4   : > { %265 = vst.msk [vmem:[%s1554_s28] sm:$0xff] %vm264_vm11, %v1347_v28 }
 0x1a5   : > { %266 = vst.msk [vmem:[%s1554_s28 + $0x8] sm:$0xff] %vm264_vm11, %v1347_v28 }
 0x1a6   : > { %267 = vst.msk [vmem:[%s1554_s28 + $0x10] sm:$0xff] %vm264_vm11, %v1347_v28 }
 0x1a7   : > { %v734_v53 = vpop.f32.mrf.mxu0  ;;  %268 = vst.msk [vmem:[%s1554_s28 + $0x18] sm:$0xff] %vm264_vm11, %v1347_v28 }
 0x1a8   : > { %v685_v54 = vpop.f32.mrf.mxu3  ;;  %v956_v13 = vmul.f32 %v734_v53, %v734_v53  ;;  %269 = vst.msk [vmem:[%s1554_s28 + $0x20] sm:$0xff] %vm264_vm11, %v1347_v28 }
 0x1a9   : > { %v955_v12 = vmul.f32 %v685_v54, %v685_v54  ;;  %v847_v15 = vadd.f32 %v734_v53, %v685_v54  ;;  %270 = vst.msk [vmem:[%s1554_s28 + $0x28] sm:$0xff] %vm264_vm11, %v1347_v28 }
 0x1aa   : > { %271 = vst.msk [vmem:[%s1554_s28 + $0x30] sm:$0xff] %vm264_vm11, %v1347_v28 }
 0x1ab   : > { %v1008_v17 = vadd.f32 %v956_v13, %v955_v12  ;;  %272 = vst.msk [vmem:[%s1554_s28 + $0x38] sm:$0xff] %vm264_vm11, %v1347_v28 }
 0x1ac   : > { %273 = vst.msk [vmem:[%s1554_s28 + $0x40] sm:$0xff] %vm264_vm11, %v1347_v28 }
 0x1ad   : > { %274 = vst.msk [vmem:[%s1554_s28 + $0x48] sm:$0xff] %vm264_vm11, %v1347_v28 }
 0x1ae   : > { %275 = vst.msk [vmem:[%s1554_s28 + $0x50] sm:$0xff] %vm264_vm11, %v1347_v28 }
 0x1af   : > { %v737_v0 = vpop.f32.mrf.mxu0  ;;  %276 = vst.msk [vmem:[%s1554_s28 + $0x58] sm:$0xff] %vm264_vm11, %v1347_v28 }
 0x1b0   : > { %v688_v2 = vpop.f32.mrf.mxu3  ;;  %277 = vst.msk [vmem:[%s1554_s28 + $0x60] sm:$0xff] %vm264_vm11, %v1347_v28 }
 0x1b1   : > { %v958_v18 = vmul.f32 %v688_v2, %v688_v2  ;;  %v851_v25 = vadd.f32 %v737_v0, %v688_v2  ;;  %278 = vst.msk [vmem:[%s1554_s28 + $0x68] sm:$0xff] %vm264_vm11, %v1347_v28 }
 0x1b2   : > { %1273 = vmatmul.msk.bf16.gmra.mxu1 %vm639_vm2, %v1289_v19  ;;  %v959_v19 = vmul.f32 %v737_v0, %v737_v0  ;;  %279 = vst.msk [vmem:[%s1554_s28 + $0x70] sm:$0xff] %vm264_vm11, %v1347_v28 }
 0x1b3   : > { %280 = vst.msk [vmem:[%s1554_s28 + $0x78] sm:$0xff] %vm264_vm11, %v1347_v28 }
 0x1b4   : > { %v1012_v26 = vadd.f32 %v959_v19, %v958_v18  ;;  %281 = vst.msk [vmem:[%s1603_s6] sm:$0xff] %vm264_vm11, %v1347_v28 }
 0x1b5   : > { %282 = vst.msk [vmem:[%s1603_s6 + $0x8] sm:$0xff] %vm264_vm11, %v1347_v28 }
 0x1b6   : > { %283 = vst.msk [vmem:[%s1603_s6 + $0x10] sm:$0xff] %vm264_vm11, %v1347_v28 }
 0x1b7   : > { %v739_v9 = vpop.f32.mrf.mxu0  ;;  %284 = vst.msk [vmem:[%s1603_s6 + $0x18] sm:$0xff] %vm264_vm11, %v1347_v28 }
 0x1b8   : > { %v690_v10 = vpop.f32.mrf.mxu3  ;;  %v962_v33 = vmul.f32 %v739_v9, %v739_v9  ;;  %285 = vst.msk [vmem:[%s1603_s6 + $0x20] sm:$0xff] %vm264_vm11, %v1347_v28 }
 0x1b9   : > { %v961_v32 = vmul.f32 %v690_v10, %v690_v10  ;;  %286 = vst.msk [vmem:[%s1603_s6 + $0x28] sm:$0xff] %vm264_vm11, %v1347_v28 }
 0x1ba   : > { %287 = vst.msk [vmem:[%s1603_s6 + $0x30] sm:$0xff] %vm264_vm11, %v1347_v28 }
 0x1bb   : > { %288 = vst.msk [vmem:[%s1603_s6 + $0x38] sm:$0xff] %vm264_vm11, %v1347_v28 }
 0x1bc   : > { %289 = vst.msk [vmem:[%s1603_s6 + $0x40] sm:$0xff] %vm264_vm11, %v1347_v28 }
 0x1bd   : > { %290 = vst.msk [vmem:[%s1603_s6 + $0x48] sm:$0xff] %vm264_vm11, %v1347_v28 }
 0x1be   : > { %291 = vst.msk [vmem:[%s1603_s6 + $0x50] sm:$0xff] %vm264_vm11, %v1347_v28 }
 0x1bf   : > { %v771_v31 = vpop.f32.mrf.mxu1  ;;  %v742_v22 = vpop.f32.mrf.mxu0  ;;  %292 = vst.msk [vmem:[%s1603_s6 + $0x58] sm:$0xff] %vm264_vm11, %v1347_v28 }
 0x1c0   : > { %v828_v34 = vadd.f32 %v827_v30, %v771_v31  ;;  %v942_v37 = vmul.f32 %v771_v31, %v771_v31  ;;  %v693_v23 = vpop.f32.mrf.mxu3  ;;  %293 = vst.msk [vmem:[%s1603_s6 + $0x60] sm:$0xff] %vm264_vm11, %v1347_v28 }
 0x1c1   : > { %v859_v49 = vadd.f32 %v742_v22, %v693_v23  ;;  %294 = vst.msk [vmem:[%s1603_s6 + $0x68] sm:$0xff] %vm264_vm11, %v1347_v28 }
 0x1c2   : > { %829 = vadd.xlane.f32.xlu2 %v828_v34  ;;  %v989_v45 = vadd.f32 %v988_v39, %v942_v37  ;;  %v855_v37 = vadd.f32 %v739_v9, %v690_v10  ;;  %295 = vst.msk [vmem:[%s1603_s6 + $0x70] sm:$0xff] %vm264_vm11, %v1347_v28 }
 0x1c3   : > { %296 = vst.msk [vmem:[%s1603_s6 + $0x78] sm:$0xff] %vm264_vm11, %v1347_v28 }
 0x1c7   : > { %v773_v44 = vpop.f32.mrf.mxu1  ;;  %v744_v34 = vpop.f32.mrf.mxu0 }
 0x1c8   : > { %v832_v47 = vadd.f32 %v831_v42, %v773_v44  ;;  %v945_v52 = vmul.f32 %v773_v44, %v773_v44  ;;  %v695_v35 = vpop.f32.mrf.mxu3  ;;  %v1016_v42 = vadd.f32 %v962_v33, %v961_v32  ;;  %v964_v44 = vmul.f32 %v693_v23, %v693_v23 }
 0x1c9   : > { %v967_v58 = vmul.f32 %v695_v35, %v695_v35 }
 0x1ca   : > { %990 = vadd.xlane.f32.xlu2 %v989_v45  ;;  %833 = vadd.xlane.f32.xlu0 %v832_v47  ;;  %v993_v59 = vadd.f32 %v992_v55, %v945_v52  ;;  %v965_v45 = vmul.f32 %v742_v22, %v742_v22 }
 0x1cf   : > { %v776_v56 = vpop.f32.mrf.mxu1  ;;  %v747_v52 = vpop.f32.mrf.mxu0 }
 0x1d0   : > { %v836_v60 = vadd.f32 %v835_v50, %v776_v56  ;;  %v948_v61 = vmul.f32 %v776_v56, %v776_v56  ;;  %v1020_v50 = vadd.f32 %v965_v45, %v964_v44  ;;  %v698_v54 = vpop.f32.mrf.mxu3 }
 0x1d1   : > { %v970_v2 = vmul.f32 %v698_v54, %v698_v54  ;;  %v867_v41 = vadd.f32 %v747_v52, %v698_v54 }
 0x1d2   : > { %994 = vadd.xlane.f32.xlu0 %v993_v59  ;;  %837 = vadd.xlane.f32.xlu1 %v836_v60  ;;  %v997_v3 = vadd.f32 %v996_v62, %v948_v61  ;;  %v968_v59 = vmul.f32 %v744_v34, %v744_v34  ;;  %v863_v61 = vadd.f32 %v744_v34, %v695_v35 }
 0x1d7   : > { %v778_v1 = vpop.f32.mrf.mxu1  ;;  %v749_v0 = vpop.f32.mrf.mxu0 }
 0x1d8   : > { %v840_v4 = vadd.f32 %v839_v63, %v778_v1  ;;  %v951_v5 = vmul.f32 %v778_v1, %v778_v1  ;;  %v1024_v63 = vadd.f32 %v968_v59, %v967_v58  ;;  %v700_v1 = vpop.f32.mrf.mxu3  ;;  %v974_v10 = vmul.f32 %v749_v0, %v749_v0 }
 0x1d9   : > { %v973_v9 = vmul.f32 %v700_v1, %v700_v1 }
 0x1da   : > { %998 = vadd.xlane.f32.xlu1 %v997_v3  ;;  %841 = vadd.xlane.f32.xlu2 %v840_v4  ;;  %v1001_v8 = vadd.f32 %v1000_v6, %v951_v5  ;;  %v971_v3 = vmul.f32 %v747_v52, %v747_v52 }
 0x1db   : > { %v1032_v13 = vadd.f32 %v974_v10, %v973_v9 }
 0x1dc   : > { %v1028_v38 = vadd.f32 %v971_v3, %v970_v2 }
 0x1df   : > { %v781_v43 = vpop.f32.mrf.mxu1 }
 0x1e0   : > { %v954_v7 = vmul.f32 %v781_v43, %v781_v43  ;;  %v844_v16 = vadd.f32 %v843_v11, %v781_v43  ;;  %v871_v11 = vadd.f32 %v749_v0, %v700_v1 }
 0x1e2   : > { %1002 = vadd.xlane.f32.xlu2 %v1001_v8  ;;  %v1005_v46 = vadd.f32 %v1004_v40, %v954_v7  ;;  %v752_v7 = vpop.f32.mrf.mxu0  ;;  %v703_v8 = vpop.f32.mrf.mxu3 }
 0x1e3   : > { %v875_v19 = vadd.f32 %v752_v7, %v703_v8 }
 0x1e4   : > { %1006 = vadd.xlane.f32.xlu0 %v1005_v46 }
 0x1e7   : > { %v783_v14 = vpop.f32.mrf.mxu1 }
 0x1e8   : > { %v957_v51 = vmul.f32 %v783_v14, %v783_v14  ;;  %v848_v21 = vadd.f32 %v847_v15, %v783_v14  ;;  %v976_v14 = vmul.f32 %v703_v8, %v703_v8  ;;  %v977_v15 = vmul.f32 %v752_v7, %v752_v7  ;;  %v814_v7 = vld [vmem:[%s1554_s28 + $0x18] sm:$0xff] }
 0x1ea   : > { %845 = vadd.xlane.f32.xlu2 %v844_v16  ;;  %v1009_v20 = vadd.f32 %v1008_v17, %v957_v51  ;;  %v754_v17 = vpop.f32.mrf.mxu0  ;;  %v705_v18 = vpop.f32.mrf.mxu3 }
 0x1ec   : > { %1010 = vadd.xlane.f32.xlu1 %v1009_v20  ;;  %849 = vadd.xlane.f32.xlu0 %v848_v21  ;;  %v1036_v20 = vadd.f32 %v977_v15, %v976_v14 }
 0x1ef   : > { %v786_v27 = vpop.f32.mrf.mxu1 }
 0x1f0   : > { %v960_v29 = vmul.f32 %v786_v27, %v786_v27  ;;  %v852_v31 = vadd.f32 %v851_v25, %v786_v27 }
 0x1f2   : > { %v1013_v30 = vadd.f32 %v1012_v26, %v960_v29  ;;  %v757_v26 = vpop.f32.mrf.mxu0  ;;  %v708_v27 = vpop.f32.mrf.mxu3 }
 0x1f3   : > { %v883_v32 = vadd.f32 %v757_v26, %v708_v27  ;;  %v983_v54 = vmul.f32 %v757_v26, %v757_v26  ;;  %v930_v26 = vld [vmem:[%s1603_s6 + $0x30] sm:$0xff] }
 0x1f4   : > { %1014 = vadd.xlane.f32.xlu2 %v1013_v30  ;;  %853 = vadd.xlane.f32.xlu1 %v852_v31  ;;  %v879_v30 = vadd.f32 %v754_v17, %v705_v18 }
 0x1f7   : > { %v788_v36 = vpop.f32.mrf.mxu1 }
 0x1f8   : > { %v963_v39 = vmul.f32 %v788_v36, %v788_v36  ;;  %v856_v48 = vadd.f32 %v855_v37, %v788_v36  ;;  %v979_v37 = vmul.f32 %v705_v18, %v705_v18  ;;  %v929_v18 = vld [vmem:[%s1603_s6 + $0x28] sm:$0xff] }
 0x1fa   : > { %v1017_v47 = vadd.f32 %v1016_v42, %v963_v39  ;;  %v710_v35 = vpop.f32.mrf.mxu3  ;;  %v759_v36 = vpop.f32.mrf.mxu0  ;;  %v980_v39 = vmul.f32 %v754_v17, %v754_v17  ;;  %v811_v42 = vld [vmem:[%s1554_s28] sm:$0xff] }
 0x1fb   : > { %v985_v45 = vmul.f32 %v710_v35, %v710_v35 }
 0x1fc   : > { %1018 = vadd.xlane.f32.xlu0 %v1017_v47  ;;  %857 = vadd.xlane.f32.xlu2 %v856_v48  ;;  %v986_v47 = vmul.f32 %v759_v36, %v759_v36  ;;  %v1040_v52 = vadd.f32 %v980_v39, %v979_v37 }
 0x1ff   : > { %v791_v53 = vpop.f32.mrf.mxu1 }
 0x200   : > { %v966_v55 = vmul.f32 %v791_v53, %v791_v53  ;;  %v860_v57 = vadd.f32 %v859_v49, %v791_v53  ;;  %v887_v49 = vadd.f32 %v759_v36, %v710_v35  ;;  %v982_v53 = vmul.f32 %v708_v27, %v708_v27  ;;  %v817_v27 = vld [vmem:[%s1554_s28 + $0x30] sm:$0xff] }
 0x202   : > { %v1021_v56 = vadd.f32 %v1020_v50, %v966_v55  ;;  %v1044_v0 = vadd.f32 %v983_v54, %v982_v53 }
 0x204   : > { %1022 = vadd.xlane.f32.xlu1 %v1021_v56  ;;  %861 = vadd.xlane.f32.xlu0 %v860_v57  ;;  %v1048_v56 = vadd.f32 %v986_v47, %v985_v45 }
 0x207   : > { %v793_v60 = vpop.f32.mrf.mxu1 }
 0x208   : > { %v969_v62 = vmul.f32 %v793_v60, %v793_v60  ;;  %v864_v24 = vadd.f32 %v863_v61, %v793_v60  ;;  %v924_v61 = vld [vmem:[%s1603_s6] sm:$0xff] }
 0x20a   : > { %v1025_v4 = vadd.f32 %v1024_v63, %v969_v62  ;;  %v812_v62 = vld [vmem:[%s1554_s28 + $0x8] sm:$0xff] }
 0x20c   : > { %1026 = vadd.xlane.f32.xlu2 %v1025_v4  ;;  %865 = vadd.xlane.f32.xlu1 %v864_v24 }
 0x20f   : > { %v796_v5 = vpop.f32.mrf.mxu1 }
 0x210   : > { %v972_v6 = vmul.f32 %v796_v5, %v796_v5  ;;  %v868_v43 = vadd.f32 %v867_v41, %v796_v5  ;;  %v925_v41 = vld [vmem:[%s1603_s6 + $0x8] sm:$0xff] }
 0x212   : > { %v1029_v40 = vadd.f32 %v1028_v38, %v972_v6  ;;  %v813_v38 = vld [vmem:[%s1554_s28 + $0x10] sm:$0xff] }
 0x214   : > { %1030 = vadd.xlane.f32.xlu0 %v1029_v40  ;;  %869 = vadd.xlane.f32.xlu2 %v868_v43  ;;  %v926_v43 = vld [vmem:[%s1603_s6 + $0x10] sm:$0xff] }
 0x217   : > { %v798_v46 = vpop.f32.mrf.mxu1 }
 0x218   : > { %v975_v12 = vmul.f32 %v798_v46, %v798_v46  ;;  %v872_v16 = vadd.f32 %v871_v11, %v798_v46  ;;  %v927_v11 = vld [vmem:[%s1603_s6 + $0x18] sm:$0xff] }
 0x21a   : > { %v1033_v51 = vadd.f32 %v1032_v13, %v975_v12  ;;  %v928_v13 = vld [vmem:[%s1603_s6 + $0x20] sm:$0xff] }
 0x21c   : > { %1034 = vadd.xlane.f32.xlu1 %v1033_v51  ;;  %873 = vadd.xlane.f32.xlu0 %v872_v16  ;;  %v815_v16 = vld [vmem:[%s1554_s28 + $0x20] sm:$0xff] }
 0x21f   : > { %v801_v21 = vpop.f32.mrf.mxu1 }
 0x220   : > { %v978_v22 = vmul.f32 %v801_v21, %v801_v21  ;;  %v876_v25 = vadd.f32 %v875_v19, %v801_v21  ;;  %v816_v19 = vld [vmem:[%s1554_s28 + $0x28] sm:$0xff] }
 0x222   : > { %v1037_v23 = vadd.f32 %v1036_v20, %v978_v22 }
 0x224   : > { %1038 = vadd.xlane.f32.xlu2 %v1037_v23  ;;  %877 = vadd.xlane.f32.xlu1 %v876_v25 }
 0x227   : > { %v803_v29 = vpop.f32.mrf.mxu1 }
 0x228   : > { %v880_v31 = vadd.f32 %v879_v30, %v803_v29  ;;  %v981_v44 = vmul.f32 %v803_v29, %v803_v29 }
 0x22a   : > { %v1041_v59 = vadd.f32 %v1040_v52, %v981_v44  ;;  %v819_v44 = vld [vmem:[%s1554_s28 + $0x40] sm:$0xff]  ;;  %v820_v52 = vld [vmem:[%s1554_s28 + $0x48] sm:$0xff] }
 0x22c   : > { %881 = vadd.xlane.f32.xlu2 %v880_v31 }
 0x22f   : > { %v806_v33 = vpop.f32.mrf.mxu1 }
 0x230   : > { %v884_v34 = vadd.f32 %v883_v32, %v806_v33  ;;  %v984_v63 = vmul.f32 %v806_v33, %v806_v33  ;;  %v931_v33 = vld [vmem:[%s1603_s6 + $0x38] sm:$0xff] }
 0x232   : > { %885 = vadd.xlane.f32.xlu0 %v884_v34  ;;  %v1045_v24 = vadd.f32 %v1044_v0, %v984_v63  ;;  %v818_v34 = vld [vmem:[%s1554_s28 + $0x38] sm:$0xff] }
 0x233   : > { %v935_v63 = vld [vmem:[%s1603_s6 + $0x58] sm:$0xff] }
 0x234   : > { %v822_v0 = vld [vmem:[%s1554_s28 + $0x58] sm:$0xff] }
 0x235   : > { %v830_v48 = vpop.xlane.xlu2 %829 }
 0x236   : > { %v891_v50 = vadd.f32 %v830_v48, %v811_v42  ;;  %v932_v42 = vld [vmem:[%s1603_s6 + $0x40] sm:$0xff] }
 0x237   : > { %v808_v55 = vpop.f32.mrf.mxu1 }
 0x238   : > { %908 = vst.msk [vmem:[%s1554_s28] sm:$0xff] %vm264_vm11, %v891_v50  ;;  %v888_v57 = vadd.f32 %v887_v49, %v808_v55  ;;  %v987_v58 = vmul.f32 %v808_v55, %v808_v55  ;;  %v933_v50 = vld [vmem:[%s1603_s6 + $0x48] sm:$0xff] }
 0x23a   : > { %1042 = vadd.xlane.f32.xlu0 %v1041_v59  ;;  %889 = vadd.xlane.f32.xlu1 %v888_v57  ;;  %v1049_v60 = vadd.f32 %v1048_v56, %v987_v58  ;;  %v934_v57 = vld [vmem:[%s1603_s6 + $0x50] sm:$0xff] }
 0x23b   : > { %v821_v58 = vld [vmem:[%s1554_s28 + $0x50] sm:$0xff] }
 0x23c   : > { %1050 = vadd.xlane.f32.xlu2 %v1049_v60 }
 0x23d   : > { %v991_v1 = vpop.xlane.xlu2 %990  ;;  %v834_v2 = vpop.xlane.xlu0 %833 }
 0x23e   : > { %v1052_v3 = vadd.f32 %v991_v1, %v924_v61  ;;  %v892_v4 = vadd.f32 %v834_v2, %v812_v62 }
 0x240   : > { %1068 = vst.msk [vmem:[%s1603_s6] sm:$0xff] %vm264_vm11, %v1052_v3 }
 0x241   : > { %909 = vst.msk [vmem:[%s1554_s28 + $0x8] sm:$0xff] %vm264_vm11, %v892_v4 }
 0x242   : > { %1046 = vadd.xlane.f32.xlu1 %v1045_v24  ;;  %v936_v24 = vld [vmem:[%s1603_s6 + $0x60] sm:$0xff] }
 0x245   : > { %v995_v28 = vpop.xlane.xlu0 %994  ;;  %v838_v5 = vpop.xlane.xlu1 %837 }
 0x246   : > { %v1053_v6 = vadd.f32 %v995_v28, %v925_v41  ;;  %v893_v40 = vadd.f32 %v838_v5, %v813_v38  ;;  %v823_v41 = vld [vmem:[%s1554_s28 + $0x60] sm:$0xff] }
 0x248   : > { %1069 = vst.msk [vmem:[%s1603_s6 + $0x8] sm:$0xff] %vm264_vm11, %v1053_v6 }
 0x249   : > { %910 = vst.msk [vmem:[%s1554_s28 + $0x10] sm:$0xff] %vm264_vm11, %v893_v40  ;;  %v824_v40 = vld [vmem:[%s1554_s28 + $0x68] sm:$0xff] }
 0x24d   : > { %v999_v8 = vpop.xlane.xlu1 %998  ;;  %v842_v9 = vpop.xlane.xlu2 %841 }
 0x24e   : > { %v1054_v10 = vadd.f32 %v999_v8, %v926_v43  ;;  %v894_v46 = vadd.f32 %v842_v9, %v814_v7  ;;  %v825_v8 = vld [vmem:[%s1554_s28 + $0x70] sm:$0xff] }
 0x250   : > { %1070 = vst.msk [vmem:[%s1603_s6 + $0x10] sm:$0xff] %vm264_vm11, %v1054_v10 }
 0x251   : > { %911 = vst.msk [vmem:[%s1554_s28 + $0x18] sm:$0xff] %vm264_vm11, %v894_v46  ;;  %v937_v46 = vld [vmem:[%s1603_s6 + $0x68] sm:$0xff] }
 0x255   : > { %v1003_v12 = vpop.xlane.xlu2 %1002 }
 0x256   : > { %v1055_v14 = vadd.f32 %v1003_v12, %v927_v11  ;;  %v826_v11 = vld [vmem:[%s1554_s28 + $0x78] sm:$0xff] }
 0x257   : > { %v1007_v15 = vpop.xlane.xlu0 %1006 }
 0x258   : > { %1071 = vst.msk [vmem:[%s1603_s6 + $0x18] sm:$0xff] %vm264_vm11, %v1055_v14  ;;  %v1056_v51 = vadd.f32 %v1007_v15, %v928_v13  ;;  %v939_v14 = vld [vmem:[%s1603_s6 + $0x78] sm:$0xff] }
 0x25a   : > { %1072 = vst.msk [vmem:[%s1603_s6 + $0x20] sm:$0xff] %vm264_vm11, %v1056_v51 }
 0x25d   : > { %v846_v17 = vpop.xlane.xlu2 %845 }
 0x25e   : > { %v895_v20 = vadd.f32 %v846_v17, %v815_v16 }
 0x25f   : > { %v1011_v21 = vpop.xlane.xlu1 %1010  ;;  %v850_v22 = vpop.xlane.xlu0 %849 }
 0x260   : > { %912 = vst.msk [vmem:[%s1554_s28 + $0x20] sm:$0xff] %vm264_vm11, %v895_v20  ;;  %v1057_v23 = vadd.f32 %v1011_v21, %v929_v18  ;;  %v896_v25 = vadd.f32 %v850_v22, %v816_v19  ;;  %v938_v18 = vld [vmem:[%s1603_s6 + $0x70] sm:$0xff] }
 0x262   : > { %1073 = vst.msk [vmem:[%s1603_s6 + $0x28] sm:$0xff] %vm264_vm11, %v1057_v23 }
 0x263   : > { %913 = vst.msk [vmem:[%s1554_s28 + $0x28] sm:$0xff] %vm264_vm11, %v896_v25 }
 0x267   : > { %v1015_v29 = vpop.xlane.xlu2 %1014  ;;  %v854_v30 = vpop.xlane.xlu1 %853 }
 0x268   : > { %v1058_v31 = vadd.f32 %v1015_v29, %v930_v26  ;;  %v897_v32 = vadd.f32 %v854_v30, %v817_v27 }
 0x26a   : > { %1074 = vst.msk [vmem:[%s1603_s6 + $0x30] sm:$0xff] %vm264_vm11, %v1058_v31 }
 0x26b   : > { %914 = vst.msk [vmem:[%s1554_s28 + $0x30] sm:$0xff] %vm264_vm11, %v897_v32 }
 0x26f   : > { %v1019_v35 = vpop.xlane.xlu0 %1018  ;;  %v858_v36 = vpop.xlane.xlu2 %857 }
 0x270   : > { %v1059_v37 = vadd.f32 %v1019_v35, %v931_v33  ;;  %v898_v39 = vadd.f32 %v858_v36, %v818_v34 }
 0x272   : > { %1075 = vst.msk [vmem:[%s1603_s6 + $0x38] sm:$0xff] %vm264_vm11, %v1059_v37 }
 0x273   : > { %915 = vst.msk [vmem:[%s1554_s28 + $0x38] sm:$0xff] %vm264_vm11, %v898_v39 }
 0x277   : > { %v1023_v45 = vpop.xlane.xlu1 %1022  ;;  %v862_v47 = vpop.xlane.xlu0 %861 }
 0x278   : > { %v1060_v48 = vadd.f32 %v1023_v45, %v932_v42  ;;  %v899_v49 = vadd.f32 %v862_v47, %v819_v44 }
 0x27a   : > { %1076 = vst.msk [vmem:[%s1603_s6 + $0x40] sm:$0xff] %vm264_vm11, %v1060_v48 }
 0x27b   : > { %916 = vst.msk [vmem:[%s1554_s28 + $0x40] sm:$0xff] %vm264_vm11, %v899_v49 }
 0x27f   : > { %v1027_v53 = vpop.xlane.xlu2 %1026  ;;  %v866_v54 = vpop.xlane.xlu1 %865 }
 0x280   : > { %v1061_v55 = vadd.f32 %v1027_v53, %v933_v50  ;;  %v900_v56 = vadd.f32 %v866_v54, %v820_v52 }
 0x282   : > { %1077 = vst.msk [vmem:[%s1603_s6 + $0x48] sm:$0xff] %vm264_vm11, %v1061_v55 }
 0x283   : > { %917 = vst.msk [vmem:[%s1554_s28 + $0x48] sm:$0xff] %vm264_vm11, %v900_v56 }
 0x287   : > { %v1031_v59 = vpop.xlane.xlu0 %1030  ;;  %v870_v60 = vpop.xlane.xlu2 %869 }
 0x288   : > { %v1062_v61 = vadd.f32 %v1031_v59, %v934_v57  ;;  %v901_v62 = vadd.f32 %v870_v60, %v821_v58 }
 0x28a   : > { %1078 = vst.msk [vmem:[%s1603_s6 + $0x50] sm:$0xff] %vm264_vm11, %v1062_v61 }
 0x28b   : > { %918 = vst.msk [vmem:[%s1554_s28 + $0x50] sm:$0xff] %vm264_vm11, %v901_v62 }
 0x28f   : > { %v1035_v1 = vpop.xlane.xlu1 %1034  ;;  %v874_v2 = vpop.xlane.xlu0 %873 }
 0x290   : > { %v1063_v3 = vadd.f32 %v1035_v1, %v935_v63  ;;  %v902_v4 = vadd.f32 %v874_v2, %v822_v0 }
 0x292   : > { %1079 = vst.msk [vmem:[%s1603_s6 + $0x58] sm:$0xff] %vm264_vm11, %v1063_v3 }
 0x293   : > { %919 = vst.msk [vmem:[%s1554_s28 + $0x58] sm:$0xff] %vm264_vm11, %v902_v4 }
 0x297   : > { %v1039_v38 = vpop.xlane.xlu2 %1038  ;;  %v878_v28 = vpop.xlane.xlu1 %877 }
 0x298   : > { %v1064_v5 = vadd.f32 %v1039_v38, %v936_v24  ;;  %v903_v6 = vadd.f32 %v878_v28, %v823_v41 }
 0x29a   : > { %1080 = vst.msk [vmem:[%s1603_s6 + $0x60] sm:$0xff] %vm264_vm11, %v1064_v5 }
 0x29b   : > { %920 = vst.msk [vmem:[%s1554_s28 + $0x60] sm:$0xff] %vm264_vm11, %v903_v6 }
 0x29f   : > { %v882_v43 = vpop.xlane.xlu2 %881 }
 0x2a0   : > { %v904_v7 = vadd.f32 %v882_v43, %v824_v40 }
 0x2a2   : > { %921 = vst.msk [vmem:[%s1554_s28 + $0x68] sm:$0xff] %vm264_vm11, %v904_v7 }
 0x2a5   : > { %v886_v9 = vpop.xlane.xlu0 %885 }
 0x2a6   : > { %v905_v10 = vadd.f32 %v886_v9, %v825_v8 }
 0x2a8   : > { %922 = vst.msk [vmem:[%s1554_s28 + $0x70] sm:$0xff] %vm264_vm11, %v905_v10 }
 0x2ad   : > { %v1043_v12 = vpop.xlane.xlu0 %1042  ;;  %v890_v13 = vpop.xlane.xlu1 %889 }
 0x2ae   : > { %v1065_v15 = vadd.f32 %v1043_v12, %v937_v46  ;;  %v906_v51 = vadd.f32 %v890_v13, %v826_v11 }
 0x2af   : > { %v1051_v16 = vpop.xlane.xlu2 %1050 }
 0x2b0   : > { %1081 = vst.msk [vmem:[%s1603_s6 + $0x68] sm:$0xff] %vm264_vm11, %v1065_v15  ;;  %v1067_v17 = vadd.f32 %v1051_v16, %v939_v14 }
 0x2b1   : > { %923 = vst.msk [vmem:[%s1554_s28 + $0x78] sm:$0xff] %vm264_vm11, %v906_v51 }
 0x2b2   : > { %1083 = vst.msk [vmem:[%s1603_s6 + $0x78] sm:$0xff] %vm264_vm11, %v1067_v17 }
 0x2b5   : > { %v1047_v19 = vpop.xlane.xlu1 %1046 }
 0x2b6   : > { %v1066_v20 = vadd.f32 %v1047_v19, %v938_v18 }
 0x2b8   : > { %1082 = vst.msk [vmem:[%s1603_s6 + $0x70] sm:$0xff] %vm264_vm11, %v1066_v20 }
 0x2b9 PF: > { %s16_s20 = sadd.s32 1, %s1344_s20   ;;  %s1770_s18 = smov %s1340_s19 }
 0x2ba   : > { %p13_p6 = scmp.ge.s32.totalorder %s16_s20, 4   ;;  %s1771_s19 = smov %s1773_s21 }
 0x2bc   :  { %15 = sbr.rel (!%p13_p6) target bundleno = 2 (0x2), region = 83 }

</bundles_post_ra>
